<compile_context>
chip_gen: v7x
topology: tpu7x:2x2x1
jax: 0.10.0
libtpu: 0.0.40
codegen_flags: <defaults>
</compile_context>

<pallas_src>
import math

import jax
import jax.numpy as jnp
from jax.experimental import pallas as pl
from jax.experimental.pallas import tpu as pltpu

OUTPUT_DIM = 7
LANE = 128          # lane width: output slab padded to this for dense stores


def _round_up(n, m):
    return ((n + m - 1) // m) * m


def mlp_kernel(x_ref, w1_ref, b1_ref, w2_ref, b2_ref, w3_ref, b3_ref, o_ref):
    # One (TB, n_inputs) batch tile per grid step. Weights are VMEM-resident.
    # Dots accumulate in f32; elementwise (bias + ReLU) stays f32.
    x = x_ref[...]
    h1 = jnp.dot(x, w1_ref[...], preferred_element_type=jnp.float32) + b1_ref[...]
    h1 = jnp.maximum(h1, 0.0)
    h2 = jnp.dot(h1.astype(w2_ref.dtype), w2_ref[...],
                 preferred_element_type=jnp.float32) + b2_ref[...]
    h2 = jnp.maximum(h2, 0.0)
    # w3/b3 are lane-padded to 128 columns -> (TB, 128) unmasked store.
    h3 = jnp.dot(h2.astype(w3_ref.dtype), w3_ref[...],
                 preferred_element_type=jnp.float32) + b3_ref[...]
    o_ref[...] = h3.astype(o_ref.dtype)


def mlp_forward(x, params, *, block_rows=512, stream_bf16=False):
    """Forward pass of the MLP via a single batch-tiled Pallas kernel.

    block_rows: target batch tile (>=512 reaches ~85% of HBM roofline for
                large B; clamped down for tiny batches).
    stream_bf16: cast x and the weights to bf16 for the HBM->MXU path
                 (halves dominant traffic); accumulation stays f32.
    """
    w1, b1, w2, b2, w3, b3 = params
    B, n_inputs = x.shape
    out_dim = w3.shape[1]

    # Lane-dense final layer: pad [8, 7] -> [8, 128] (zero columns), so the
    # kernel writes a full 128-lane slab; sliced back below.
    w3p = jnp.pad(w3, ((0, 0), (0, LANE - out_dim)))
    b3p = jnp.pad(b3, ((0, 0), (0, LANE - out_dim)))

    # Batch tile: multiple of 8 sublanes, capped at block_rows.
    tb = min(block_rows, _round_up(B, 8))
    Bp = _round_up(B, tb)
    if Bp != B:
        x = jnp.pad(x, ((0, Bp - B), (0, 0)))  # zero rows -> discarded later

    if stream_bf16:
        xk = x.astype(jnp.bfloat16)
        w1k = w1.astype(jnp.bfloat16)
        w2k = w2.astype(jnp.bfloat16)
        w3k = w3p.astype(jnp.bfloat16)
    else:
        xk, w1k, w2k, w3k = x, w1, w2, w3p

    # VMEM budget: double-buffered x / out tiles + resident weights. Sized
    # explicitly so it stays valid on v7x (64 MiB physical, 32 MiB default).
    x_bytes = jnp.dtype(xk.dtype).itemsize
    resident = sum(math.prod(a.shape) * jnp.dtype(a.dtype).itemsize
                   for a in (w1k, b1, w2k, b2, w3k, b3p))
    needed = 2 * tb * n_inputs * x_bytes + 2 * tb * LANE * 4 + resident
    vmem_limit = min(64 * 1024 * 1024, max(32 * 1024 * 1024, 2 * needed))

    grid = (Bp // tb,)

    out = pl.pallas_call(
        mlp_kernel,
        out_shape=jax.ShapeDtypeStruct((Bp, LANE), jnp.float32),
        grid=grid,
        in_specs=[
            pl.BlockSpec((tb, n_inputs), lambda i: (i, 0)),   # x: streamed
            pl.BlockSpec(w1k.shape, lambda i: (0, 0)),        # weights: resident
            pl.BlockSpec(b1.shape, lambda i: (0, 0)),
            pl.BlockSpec(w2k.shape, lambda i: (0, 0)),
            pl.BlockSpec(b2.shape, lambda i: (0, 0)),
            pl.BlockSpec(w3k.shape, lambda i: (0, 0)),
            pl.BlockSpec(b3p.shape, lambda i: (0, 0)),
        ],
        out_specs=pl.BlockSpec((tb, LANE), lambda i: (i, 0)),
        compiler_params=pltpu.CompilerParams(
            dimension_semantics=("parallel",),   # megacore sharding on v7x
            vmem_limit_bytes=int(vmem_limit),
        ),
    )(xk, w1k, b1, w2k, b2, w3k, b3p)

    # Drop batch padding and lane padding.
    return out[:B, :out_dim]


# ----------------------------- init / reference -----------------------------

def xavier_uniform(key, fan_in, fan_out):
    # Matches torch.nn.init.xavier_uniform_ (gain=1.0); stored as [in, out].
    bound = math.sqrt(6.0 / (fan_in + fan_out))
    return jax.random.uniform(
        key, (fan_in, fan_out), minval=-bound, maxval=bound, dtype=jnp.float32
    )


def linear_bias(key, fan_in, fan_out):
    # PyTorch Linear default bias init: U(-1/sqrt(fan_in), 1/sqrt(fan_in)).
    bound = 1.0 / math.sqrt(fan_in)
    return jax.random.uniform(
        key, (1, fan_out), minval=-bound, maxval=bound, dtype=jnp.float32
    )


def init_params(key, n_inputs):
    k = jax.random.split(key, 6)
    w1 = xavier_uniform(k[0], n_inputs, 10)
    b1 = linear_bias(k[1], n_inputs, 10)
    w2 = xavier_uniform(k[2], 10, 8)
    b2 = linear_bias(k[3], 10, 8)
    w3 = xavier_uniform(k[4], 8, OUTPUT_DIM)
    b3 = linear_bias(k[5], 8, OUTPUT_DIM)
    return (w1, b1, w2, b2, w3, b3)


def reference_forward(x, params):
    w1, b1, w2, b2, w3, b3 = params
    h1 = jnp.maximum(x @ w1 + b1, 0.0)
    h2 = jnp.maximum(h1 @ w2 + b2, 0.0)
    return h2 @ w3 + b3


if __name__ == "__main__":
    key = jax.random.PRNGKey(0)
    k_x, k_p = jax.random.split(key)

    batch = 2
    n_inputs = 16
    x = jax.random.normal(k_x, (batch, n_inputs), dtype=jnp.float32)
    params = init_params(k_p, n_inputs)
    ref = reference_forward(x, params)

    # f32 path (exact match to the PyTorch-semantics reference).
    out = jax.block_until_ready(mlp_forward(x, params))
    assert out.shape == (batch, OUTPUT_DIM), out.shape
    assert jnp.allclose(out, ref, atol=1e-5, rtol=1e-5), "f32 mismatch vs reference"

    # bf16-streaming path (perf mode: half the HBM traffic; f32 accumulate).
    out_bf16 = jax.block_until_ready(mlp_forward(x, params, stream_bf16=True))
    assert jnp.allclose(out_bf16, ref, atol=5e-2, rtol=5e-2), "bf16 mismatch"

    # Larger, non-multiple batch exercising the grid + tail padding.
    big_b = 1000
    x_big = jax.random.normal(k_x, (big_b, n_inputs), dtype=jnp.float32)
    out_big = jax.block_until_ready(mlp_forward(x_big, params, block_rows=512))
    ref_big = reference_forward(x_big, params)
    assert out_big.shape == (big_b, OUTPUT_DIM), out_big.shape
    assert jnp.allclose(out_big, ref_big, atol=1e-5, rtol=1e-5), "tiled mismatch"

    print("KERNEL_OK")
</pallas_src>

<mosaic_0001>
module attributes {stable_mosaic.version = 11 : i64} {
  func.func @mlp_kernel(%arg0: i32, %arg1: memref<8x16xf32, #tpu.memory_space<vmem>>, %arg2: memref<16x10xf32, #tpu.memory_space<vmem>>, %arg3: memref<1x10xf32, #tpu.memory_space<vmem>>, %arg4: memref<10x8xf32, #tpu.memory_space<vmem>>, %arg5: memref<1x8xf32, #tpu.memory_space<vmem>>, %arg6: memref<8x128xf32, #tpu.memory_space<vmem>>, %arg7: memref<1x128xf32, #tpu.memory_space<vmem>>, %arg8: memref<8x128xf32, #tpu.memory_space<vmem>>) attributes {dimension_semantics = [#tpu.dimension_semantics<parallel>], iteration_bounds = array<i64: 1>, scalar_prefetch = 0 : i64, scratch_operands = 0 : i64, tpu.core_type = #tpu.core_type<tc>, window_params = [{transform_indices = @transform_0, window_bounds = array<i64: 8, 16>}, {pipeline_mode = #tpu.pipeline_mode<synchronous>, transform_indices = @transform_1, window_bounds = array<i64: 16, 10>}, {pipeline_mode = #tpu.pipeline_mode<synchronous>, transform_indices = @transform_2, window_bounds = array<i64: 1, 10>}, {pipeline_mode = #tpu.pipeline_mode<synchronous>, transform_indices = @transform_3, window_bounds = array<i64: 10, 8>}, {pipeline_mode = #tpu.pipeline_mode<synchronous>, transform_indices = @transform_4, window_bounds = array<i64: 1, 8>}, {pipeline_mode = #tpu.pipeline_mode<synchronous>, transform_indices = @transform_5, window_bounds = array<i64: 8, 128>}, {pipeline_mode = #tpu.pipeline_mode<synchronous>, transform_indices = @transform_6, window_bounds = array<i64: 1, 128>}, {transform_indices = @transform_7, window_bounds = array<i64: 8, 128>}]} {
    %c0 = arith.constant 0 : index
    %c0_0 = arith.constant 0 : index
    %0 = vector.load %arg1[%c0, %c0_0] : memref<8x16xf32, #tpu.memory_space<vmem>>, vector<8x16xf32>
    %c0_1 = arith.constant 0 : index
    %c0_2 = arith.constant 0 : index
    %1 = vector.load %arg2[%c0_1, %c0_2] : memref<16x10xf32, #tpu.memory_space<vmem>>, vector<16x10xf32>
    %cst = arith.constant dense<0.000000e+00> : vector<8x10xf32>
    %2 = tpu.matmul %0, %1, %cst {dimension_numbers = #tpu.dot_dimension_numbers<[1], [0], [0], [1], [0, 0, 1, 1], [], []>} : vector<8x16xf32>, vector<16x10xf32>, vector<8x10xf32> -> vector<8x10xf32>
    %c0_3 = arith.constant 0 : index
    %c0_4 = arith.constant 0 : index
    %3 = vector.load %arg3[%c0_3, %c0_4] : memref<1x10xf32, #tpu.memory_space<vmem>>, vector<1x10xf32>
    %4 = vector.broadcast %3 : vector<1x10xf32> to vector<8x10xf32>
    %5 = arith.addf %2, %4 : vector<8x10xf32>
    %cst_5 = arith.constant 0.000000e+00 : f32
    %6 = vector.broadcast %cst_5 : f32 to vector<8x10xf32>
    %7 = arith.maximumf %5, %6 : vector<8x10xf32>
    %c0_6 = arith.constant 0 : index
    %c0_7 = arith.constant 0 : index
    %8 = vector.load %arg4[%c0_6, %c0_7] : memref<10x8xf32, #tpu.memory_space<vmem>>, vector<10x8xf32>
    %cst_8 = arith.constant dense<0.000000e+00> : vector<8x8xf32>
    %9 = tpu.matmul %7, %8, %cst_8 {dimension_numbers = #tpu.dot_dimension_numbers<[1], [0], [0], [1], [0, 0, 1, 1], [], []>} : vector<8x10xf32>, vector<10x8xf32>, vector<8x8xf32> -> vector<8x8xf32>
    %c0_9 = arith.constant 0 : index
    %c0_10 = arith.constant 0 : index
    %10 = vector.load %arg5[%c0_9, %c0_10] : memref<1x8xf32, #tpu.memory_space<vmem>>, vector<1x8xf32>
    %11 = vector.broadcast %10 : vector<1x8xf32> to vector<8x8xf32>
    %12 = arith.addf %9, %11 : vector<8x8xf32>
    %cst_11 = arith.constant 0.000000e+00 : f32
    %13 = vector.broadcast %cst_11 : f32 to vector<8x8xf32>
    %14 = arith.maximumf %12, %13 : vector<8x8xf32>
    %c0_12 = arith.constant 0 : index
    %c0_13 = arith.constant 0 : index
    %15 = vector.load %arg6[%c0_12, %c0_13] : memref<8x128xf32, #tpu.memory_space<vmem>>, vector<8x128xf32>
    %cst_14 = arith.constant dense<0.000000e+00> : vector<8x128xf32>
    %16 = tpu.matmul %14, %15, %cst_14 {dimension_numbers = #tpu.dot_dimension_numbers<[1], [0], [0], [1], [0, 0, 1, 1], [], []>} : vector<8x8xf32>, vector<8x128xf32>, vector<8x128xf32> -> vector<8x128xf32>
    %c0_15 = arith.constant 0 : index
    %c0_16 = arith.constant 0 : index
    %17 = vector.load %arg7[%c0_15, %c0_16] : memref<1x128xf32, #tpu.memory_space<vmem>>, vector<1x128xf32>
    %18 = vector.broadcast %17 : vector<1x128xf32> to vector<8x128xf32>
    %19 = arith.addf %16, %18 : vector<8x128xf32>
    %c0_17 = arith.constant 0 : index
    %c0_18 = arith.constant 0 : index
    %20 = vector.load %arg8[%c0_17, %c0_18] : memref<8x128xf32, #tpu.memory_space<vmem>>, vector<8x128xf32>
    tpu.vector_store %arg8[%c0_17, %c0_18], %19 {strides = array<i32>} : memref<8x128xf32, #tpu.memory_space<vmem>>, vector<8x128xf32>,
    return
  }
  func.func @transform_0(%arg0: i32) -> (i32, i32) {
    %c0_i32 = arith.constant 0 : i32
    %c0_i32_0 = arith.constant 0 : i32
    return %arg0, %c0_i32 : i32, i32
  }
  func.func @transform_1(%arg0: i32) -> (i32, i32) {
    %c0_i32 = arith.constant 0 : i32
    %c0_i32_0 = arith.constant 0 : i32
    %c0_i32_1 = arith.constant 0 : i32
    return %c0_i32, %c0_i32_0 : i32, i32
  }
  func.func @transform_2(%arg0: i32) -> (i32, i32) {
    %c0_i32 = arith.constant 0 : i32
    %c0_i32_0 = arith.constant 0 : i32
    %c0_i32_1 = arith.constant 0 : i32
    return %c0_i32, %c0_i32_0 : i32, i32
  }
  func.func @transform_3(%arg0: i32) -> (i32, i32) {
    %c0_i32 = arith.constant 0 : i32
    %c0_i32_0 = arith.constant 0 : i32
    %c0_i32_1 = arith.constant 0 : i32
    return %c0_i32, %c0_i32_0 : i32, i32
  }
  func.func @transform_4(%arg0: i32) -> (i32, i32) {
    %c0_i32 = arith.constant 0 : i32
    %c0_i32_0 = arith.constant 0 : i32
    %c0_i32_1 = arith.constant 0 : i32
    return %c0_i32, %c0_i32_0 : i32, i32
  }
  func.func @transform_5(%arg0: i32) -> (i32, i32) {
    %c0_i32 = arith.constant 0 : i32
    %c0_i32_0 = arith.constant 0 : i32
    %c0_i32_1 = arith.constant 0 : i32
    return %c0_i32, %c0_i32_0 : i32, i32
  }
  func.func @transform_6(%arg0: i32) -> (i32, i32) {
    %c0_i32 = arith.constant 0 : i32
    %c0_i32_0 = arith.constant 0 : i32
    %c0_i32_1 = arith.constant 0 : i32
    return %c0_i32, %c0_i32_0 : i32, i32
  }
  func.func @transform_7(%arg0: i32) -> (i32, i32) {
    %c0_i32 = arith.constant 0 : i32
    %c0_i32_0 = arith.constant 0 : i32
    return %arg0, %c0_i32 : i32, i32
  }
}

</mosaic_0001>

<bundles_post_ra>
// kernel: tpu_custom_call.1
= control target key start
LH: loop header
LB: loop body
LE: loop exit
PB: predicated region body
PF: predicated region fallthrough
CT: control target
= control target key end

     0   :  { %v367_v2 = vmov 0.0|0.0   ;;  %vm368_vm0 = vmmov 0   ;;  %v369_v4 = vmov 0.0   ;;  %s451_s0 = inlined_call_operand.vmem [shape: f32[8,16], index: 0, kind: input, shape index: {}]   ;;  %s452_s1 = inlined_call_operand.vmem [shape: f32[16,10], index: 1, kind: input, shape index: {}]   ;;  %s453_s2 = inlined_call_operand.vmem [shape: f32[1,10], index: 2, kind: input, shape index: {}]   ;;  %s454_s3 = inlined_call_operand.vmem [shape: f32[10,8], index: 3, kind: input, shape index: {}]   ;;  %s455_s4 = inlined_call_operand.vmem [shape: f32[1,8], index: 4, kind: input, shape index: {}]   ;;  %s456_s5 = inlined_call_operand.vmem [shape: f32[8,128], index: 5, kind: input, shape index: {}]   ;;  %s457_s6 = inlined_call_operand.vmem [shape: f32[1,128], index: 6, kind: input, shape index: {}]   ;;  %s458_s7 = inlined_call_operand.hbm [shape: f32[8,128], index: 7, kind: output, shape index: {}]  }
   0x1   :  { %v28_v0 = vld [vmem:[%s452_s1] sm:$0xff]  ;;  %v29_v1 = vld [vmem:[%s452_s1 + $0x8] sm:$0xff]  ;;  %331 = vmatprep.subr.bf16.mxu0 %v367_v2  ;;  %316 = vmatprep.mubr.msk.f32.mxu0 %vm368_vm0, %v369_v4 }
   0x2   :  { %v332_v3 = vpack.c.bf16 %v29_v1, %v28_v0 }
   0x3   :  { %12 = vsyncpa [#allocation3], 0  ;;  %334 = vmatprep.subr.bf16.mxu1 %v367_v2  ;;  %323 = vmatprep.mubr.msk.f32.mxu1 %vm368_vm0, %v369_v4  ;;  %v27_v5 = vld [vmem:[%s451_s0] sm:$0xff]  ;;  %vm37_vm1 = vcmask 130048   ;;  %v113_v7 = vld [vmem:[%s454_s3 + $0x8] sm:$0x3] }
   0x4   :  { %333 = vmatpush3.bf16.msra.mxu0 %v332_v3  ;;  %v112_v6 = vld [vmem:[%s454_s3] sm:$0xff]  ;;  %vm125_vm2 = vcmask 1041408   ;;  %vm370_vm3 = vmmov 1   ;;  %vm121_vm5 = vcmask 80896   ;;  %vm208_vm6 = vcmask 64512   ;;  %s371_s15 = smov [#allocation2]  }
   0x5   :  { %326 = vmatprep.subr.mxu0 %v369_v4  ;;  %v335_v8 = vpack.c.bf16 %v113_v7, %v112_v6  ;;  %vm336_vm4 = vmpackc.low %vm125_vm2, %vm370_vm3  ;;  %v297_v9 = vld [vmem:[%s453_s2] ss:$0 sm:$0xff]  ;;  %s289_s16 = sshll.u32 %s371_s15, 4  ;;  %s290_s16 = int_to_ptr.vmem [resolvable:$true] %s289_s16 }
   0x6   :  { %v200_v14 = vld [vmem:[%s456_s5] sm:$0xff]  ;;  %s343_s5 = scalar_lea.vmem %s290_s16, 128  ;;  %p348_p1 = scmp.lt.s32.totalorder %s290_s16, %s290_s16 }
   0x7   :  { %317 = vmatmul.mubr.msk.f32.vlgmr.msra.gmra.mrb[0].mxu0 %vm37_vm1, %v27_v5  ;;  %337 = vmatpush3.bf16.msk.msra.mxu1 %vm336_vm4, %v335_v8  ;;  %v299_v15 = vld [vmem:[%s455_s4] ss:$0 sm:$0xff]  ;;  %p344_p0 = scmp.ne.s32.totalorder %s290_s16, %s343_s5  ;;  %p349_p2 = scmp.lt.s32.totalorder %s343_s5, %s343_s5 }
   0x8   :  { %328 = vmatprep.mubr.msk.f32.mxu0 %vm368_vm0, %v369_v4  ;;  %327 = vmatpush3.msra.mxu0 %v200_v14  ;;  %v302_v20 = vld [vmem:[%s457_s6] ss:$0 sm:$0xff] }
   0x9   :  { %p350_p3 = por %p349_p2, %p348_p1 }
   0xb   :  { %p351_p4 = pnand %p350_p3, %p344_p0 }
  0xda   :  { %v107_v10 = vpop.f32.mrb[0].mxu0 }
  0xdb   :  { %v108_v11 = vadd.f32 %v297_v9, %v107_v10  ;;  %v318_v12 = vpop.f32.mrb[1].mxu0 }
  0xdd   :  { %v111_v13 = vmax.f32 %v108_v11, 0.0 }
  0xdf   :  { %324 = vmatmul.mubr.msk.f32.vlgmr.msra.gmra.mrb[0].mxu1 %vm121_vm5, %v111_v13 }
 0x1b2   :  { %v195_v16 = vpop.f32.mrb[0].mxu1 }
 0x1b3   :  { %v196_v17 = vadd.f32 %v299_v15, %v195_v16  ;;  %v325_v18 = vpop.f32.mrb[1].mxu1 }
 0x1b5   :  { %v199_v19 = vmax.f32 %v196_v17, 0.0 }
 0x1b7   :  { %329 = vmatmul.mubr.msk.f32.vlgmr.msra.gmra.mrb[2].mxu0 %vm208_vm6, %v199_v19 }
 0x28a   :  { %v278_v21 = vpop.f32.mrb[2].mxu0 }
 0x28b   :  { %v279_v22 = vadd.f32 %v302_v20, %v278_v21  ;;  %v330_v23 = vpop.f32.mrb[3].mxu0 }
 0x28d   :  { %282 = vst [vmem:[#allocation2] sm:$0xff] %v279_v22 }
 0x28e   :  { %354 = shalt.err (!%p351_p4)
}
 0x28f   :  { %s355_s18 = scalar_lea.hbm %s458_s7, 128 }
 0x290   :  { %p356_p5 = scmp.ne.s32.totalorder %s458_s7, %s355_s18  ;;  %p359_p6 = scmp.lt.u32.totalorder %s355_s18, %s458_s7 }
 0x292   :  { %p361_p7 = pnand %p359_p6, %p356_p5 }
 0x294   :  { %364 = shalt.err (!%p361_p7)
}
 0x295   :  { %292 = dma.vmem_to_hbm [thread:$0]  %s290_s16, 128, %s458_s7, [#allocation3]  }
 0x296   :  { %365 = dma.done.wait [#allocation3], 128  }
 0x297   :  { %366 = vsyncadd [#allocation3], 4294967168 }
 0x298   :  { %296 = vsyncpa [#allocation3], 1 }

</bundles_post_ra>
